<compile_context>
chip_gen: v6e
topology: v6e:2x2x1
jax: 0.10.0
libtpu: 0.0.40
codegen_flags: <defaults>
</compile_context>

<pallas_src>
import functools

import jax
import jax.numpy as jnp
from jax.experimental import pallas as pl
from jax.experimental.pallas import tpu as pltpu


def _round_up(x: int, m: int) -> int:
    return ((x + m - 1) // m) * m


def _ce_per_sample_kernel(y_hat_ref, tgt_ref, out_ref, *, n_total: int, tile_n: int):
    """Writes the per-sample NLL for one batch tile.

    y_hat_ref: (tile_n, C) logits tile        (VMEM)
    tgt_ref:   (tile_n, 1) int32 target index (VMEM)
    out_ref:   (tile_n, 1) f32 per-sample loss (0 for padded rows)
    """
    i = pl.program_id(0)

    logits = y_hat_ref[...].astype(jnp.float32)               # (tile_n, C)
    tgt = tgt_ref[...]                                         # (tile_n, 1) int32
    tn, c = logits.shape

    # Select the target logit with a lane-index compare — no dense one-hot
    # matrix ever leaves HBM.
    col = jax.lax.broadcasted_iota(jnp.int32, (tn, c), 1)      # (tile_n, C)
    tgt_logit = jnp.sum(jnp.where(col == tgt, logits, 0.0),
                        axis=-1, keepdims=True)                # (tile_n, 1)

    # Numerically stable log-sum-exp along the class (lane) axis.
    m = jnp.max(logits, axis=-1, keepdims=True)                # (tile_n, 1)
    lse = jnp.log(jnp.sum(jnp.exp(logits - m), axis=-1, keepdims=True))

    # Since the one-hot row sums to 1:
    #   -sum_c onehot * log_softmax(logits) = m + lse - logits[target]
    per_sample = m + lse - tgt_logit                           # (tile_n, 1)

    # Mask rows beyond the true batch size (padded final tile). jnp.where is a
    # select, so garbage/NaN from padded rows cannot leak through.
    row_ids = i * tile_n + jax.lax.broadcasted_iota(jnp.int32, (tn, 1), 0)
    out_ref[...] = jnp.where(row_ids < n_total, per_sample, 0.0)


def _choose_tile_n(n: int, c: int, itemsize: int,
                   vmem_budget_bytes: int = 24 * 1024 * 1024,
                   max_tile_n: int = 2048) -> int:
    """Largest batch tile whose double-buffered inputs fit a conservative VMEM
    budget (safe on v5e 16 MiB / v6e 32 MiB / v7x 32 MiB scoped defaults)."""
    # 2 pipeline buffers x (logits tile + int32 target column + f32 output col)
    bytes_per_row = 2 * (c * itemsize + 4 + 4)
    tile = vmem_budget_bytes // max(bytes_per_row, 1)
    tile = min(tile, max_tile_n, _round_up(n, 8))
    tile = max(8, (tile // 8) * 8)                              # sublane multiple
    return tile


def one_hot_cross_entropy_loss(y_hat: jax.Array, y: jax.Array) -> jax.Array:
    """y_hat: (N, C) logits, y: (N, C) one-hot. Returns scalar mean CE loss."""
    assert y_hat.shape == y.shape and y_hat.ndim == 2
    n, c = y_hat.shape

    # Module semantics: y.argmax(dim=1). Tiny reduction done in plain JAX so
    # the kernel never streams the dense f32 one-hot matrix.
    targets = jnp.argmax(y, axis=1).astype(jnp.int32).reshape(n, 1)

    tile_n = _choose_tile_n(n, c, y_hat.dtype.itemsize)
    num_blocks = pl.cdiv(n, tile_n)
    n_padded = num_blocks * tile_n

    kernel = functools.partial(_ce_per_sample_kernel, n_total=n, tile_n=tile_n)

    per_sample = pl.pallas_call(
        kernel,
        out_shape=jax.ShapeDtypeStruct((n_padded, 1), jnp.float32),
        grid=(num_blocks,),
        in_specs=[
            pl.BlockSpec((tile_n, c), lambda i: (i, 0)),
            pl.BlockSpec((tile_n, 1), lambda i: (i, 0)),
        ],
        out_specs=pl.BlockSpec((tile_n, 1), lambda i: (i, 0)),
        compiler_params=pltpu.CompilerParams(
            dimension_semantics=("parallel",),        # both TCs on v7x
            vmem_limit_bytes=32 * 1024 * 1024,
        ),
    )(y_hat, targets)

    # Padded rows are exactly 0, so a plain sum over the padded vector is exact.
    # Divide by the TRUE batch size exactly once (not a per-block mean).
    return jnp.sum(per_sample) / jnp.float32(n)


if __name__ == "__main__":
    key = jax.random.PRNGKey(0)
    k1, k2 = jax.random.split(key)

    N, C = 8, 16  # small shapes consistent with (batch, num_classes)

    # Deterministic logits.
    y_hat = jax.random.normal(k1, (N, C), dtype=jnp.float32)

    # Deterministic one-hot targets.
    targets = jax.random.randint(k2, (N,), 0, C)
    y = jax.nn.one_hot(targets, C, dtype=jnp.float32)

    # Mirror the module's assertion: each row of y sums to exactly 1.
    assert bool(jnp.all(jnp.sum(y, axis=1) == 1.0))

    loss = one_hot_cross_entropy_loss(y_hat, y)
    jax.block_until_ready(loss)

    # Pure-JAX reference check (same math, no Pallas).
    logp = jax.nn.log_softmax(y_hat, axis=-1)
    ref = -jnp.mean(logp[jnp.arange(N), targets])
    assert jnp.allclose(loss, ref, atol=1e-5, rtol=1e-5), (loss, ref)

    print("KERNEL_OK")
</pallas_src>

<mosaic_0001>
module attributes {stable_mosaic.version = 11 : i64} {
  func.func @_ce_per_sample_kernel(%arg0: i32, %arg1: memref<8x16xf32, #tpu.memory_space<vmem>>, %arg2: memref<8x1xi32, #tpu.memory_space<vmem>>, %arg3: memref<8x1xf32, #tpu.memory_space<vmem>>) attributes {dimension_semantics = [#tpu.dimension_semantics<parallel>], iteration_bounds = array<i64: 1>, scalar_prefetch = 0 : i64, scratch_operands = 0 : i64, tpu.core_type = #tpu.core_type<tc>, window_params = [{transform_indices = @transform_0, window_bounds = array<i64: 8, 16>}, {transform_indices = @transform_1, window_bounds = array<i64: 8, 1>}, {transform_indices = @transform_2, window_bounds = array<i64: 8, 1>}]} {
    %c0 = arith.constant 0 : index
    %c0_0 = arith.constant 0 : index
    %0 = vector.load %arg1[%c0, %c0_0] : memref<8x16xf32, #tpu.memory_space<vmem>>, vector<8x16xf32>
    %c0_1 = arith.constant 0 : index
    %c0_2 = arith.constant 0 : index
    %1 = vector.load %arg2[%c0_1, %c0_2] : memref<8x1xi32, #tpu.memory_space<vmem>>, vector<8x1xi32>
    %2 = tpu.iota {dimensions = array<i32: 1>} : vector<8x16xi32>
    %3 = vector.broadcast %1 : vector<8x1xi32> to vector<8x16xi32>
    %4 = arith.cmpi eq, %2, %3 : vector<8x16xi32>
    %cst = arith.constant 0.000000e+00 : f32
    %5 = vector.broadcast %cst : f32 to vector<8x16xf32>
    %6 = arith.select %4, %0, %5 : vector<8x16xi1>, vector<8x16xf32>
    %cst_3 = arith.constant dense<0.000000e+00> : vector<8xf32>
    %7 = vector.multi_reduction <add>, %6, %cst_3 [1] : vector<8x16xf32> to vector<8xf32>
    %8 = vector.shape_cast %7 : vector<8xf32> to vector<8x1xf32>
    %cst_4 = arith.constant dense<0xFF800000> : vector<8xf32>
    %9 = vector.multi_reduction <maximumf>, %0, %cst_4 [1] : vector<8x16xf32> to vector<8xf32>
    %10 = vector.shape_cast %9 : vector<8xf32> to vector<8x1xf32>
    %11 = vector.broadcast %10 : vector<8x1xf32> to vector<8x16xf32>
    %12 = arith.subf %0, %11 : vector<8x16xf32>
    %13 = math.exp %12 : vector<8x16xf32>
    %cst_5 = arith.constant dense<0.000000e+00> : vector<8xf32>
    %14 = vector.multi_reduction <add>, %13, %cst_5 [1] : vector<8x16xf32> to vector<8xf32>
    %15 = vector.shape_cast %14 : vector<8xf32> to vector<8x1xf32>
    %16 = math.log %15 : vector<8x1xf32>
    %17 = arith.addf %10, %16 : vector<8x1xf32>
    %18 = arith.subf %17, %8 : vector<8x1xf32>
    %c8_i32 = arith.constant 8 : i32
    %19 = arith.muli %arg0, %c8_i32 : i32
    %20 = tpu.iota {dimensions = array<i32: 0>} : vector<8x1xi32>
    %21 = vector.broadcast %19 : i32 to vector<8x1xi32>
    %22 = arith.addi %21, %20 : vector<8x1xi32>
    %c8_i32_6 = arith.constant 8 : i32
    %23 = vector.broadcast %c8_i32_6 : i32 to vector<8x1xi32>
    %24 = arith.cmpi slt, %22, %23 : vector<8x1xi32>
    %cst_7 = arith.constant 0.000000e+00 : f32
    %25 = vector.broadcast %cst_7 : f32 to vector<8x1xf32>
    %26 = arith.select %24, %18, %25 : vector<8x1xi1>, vector<8x1xf32>
    %c0_8 = arith.constant 0 : index
    %c0_9 = arith.constant 0 : index
    %27 = vector.load %arg3[%c0_8, %c0_9] : memref<8x1xf32, #tpu.memory_space<vmem>>, vector<8x1xf32>
    tpu.vector_store %arg3[%c0_8, %c0_9], %26 {strides = array<i32>} : memref<8x1xf32, #tpu.memory_space<vmem>>, vector<8x1xf32>,
    return
  }
  func.func @transform_0(%arg0: i32) -> (i32, i32) {
    %c0_i32 = arith.constant 0 : i32
    %c0_i32_0 = arith.constant 0 : i32
    return %arg0, %c0_i32 : i32, i32
  }
  func.func @transform_1(%arg0: i32) -> (i32, i32) {
    %c0_i32 = arith.constant 0 : i32
    %c0_i32_0 = arith.constant 0 : i32
    return %arg0, %c0_i32 : i32, i32
  }
  func.func @transform_2(%arg0: i32) -> (i32, i32) {
    %c0_i32 = arith.constant 0 : i32
    %c0_i32_0 = arith.constant 0 : i32
    return %arg0, %c0_i32 : i32, i32
  }
}

</mosaic_0001>

<bundles_post_ra>
// kernel: tpu_custom_call.1
= control target key start
LH: loop header
LB: loop body
LE: loop exit
PB: predicated region body
PF: predicated region fallthrough
CT: control target
= control target key end

     0   :  { %vm20_vm0 = vcmask 130048   ;;  %v56_v1 = vmov 0   ;;  %v13_v7 = vlaneseq  ;;  %vm44_vm2 = vcmask 7168   ;;  %s84_s0 = inlined_call_operand.vmem [shape: f32[8,16], index: 0, kind: input, shape index: {}]   ;;  %s85_s1 = inlined_call_operand.vmem [shape: s32[8,1], index: 1, kind: input, shape index: {}]   ;;  %s86_s2 = inlined_call_operand.vmem [shape: f32[8,1], index: 2, kind: output, shape index: {}]  }
   0x1   :  { %v11_v0 = vld [vmem:[%s84_s0] sm:$0xff]  ;;  %51 = vset.pattern.permute.xlu0 %v56_v1 }
   0x2   :  { %v24_v2 = vsel %vm20_vm0, %v11_v0, -inf  ;;  %v12_v3 = vld [vmem:[%s85_s1] sm:$0xff]  ;;  %v14_v8 = vand.u32 127, %v13_v7 }
   0x3   :  { %25 = vmax.xlane.f32.xlu0 %v24_v2 }
  0x19   :  { %16 = vperm.xlu0 %51, %v12_v3  }
  0x8c   :  { %v26_v4 = vpop.xlane.xlu0 %25 }
  0x8d   :  { %v27_v5 = vsub.f32 %v11_v0, %v26_v4 }
  0x8f   :  { %v28_v6 = vmul.f32 1.442695, %v27_v5 }
  0x91   :  { %52 = vpow2.f32 %v28_v6 }
  0x94   :  { %v17_v9 = vpop.permute.xlu0 %16 }
  0x95   :  { %vm18_vm1 = vcmp.eq.s32.totalorder %v14_v8, %v17_v9 }
  0x96   :  { %v19_v11 = vsel %vm18_vm1, %v11_v0, 0.0 }
  0x97   :  { %v21_v13 = vsel %vm20_vm0, %v19_v11, 0.0 }
  0x9e   :  { %v53_v10 = vpop.eup %52 }
  0x9f   :  { %v30_v12 = vsel %vm20_vm0, %v53_v10, 0.0 }
  0xa0   :  { %31 = vadd.xlane.f32.xlu1 %v30_v12 }
  0xa4   :  { %22 = vadd.xlane.f32.xlu1 %v21_v13 }
 0x129   :  { %v32_v14 = vpop.xlane.xlu1 %31 }
 0x12a   :  { %54 = vlog2.f32 %v32_v14 }
 0x12d   :  { %v23_v17 = vpop.xlane.xlu1 %22 }
 0x137   :  { %v55_v15 = vpop.eup %54 }
 0x138   :  { %v34_v16 = vmul.f32 0.6931472, %v55_v15 }
 0x13a   :  { %v35_v18 = vadd.f32 %v34_v16, %v26_v4 }
 0x13c   :  { %v36_v19 = vsub.f32 %v35_v18, %v23_v17 }
 0x13e   :  { %45 = vst.msk [vmem:[%s86_s2] sm:$0xff] %vm44_vm2, %v36_v19 }

</bundles_post_ra>
